<compile_context>
chip_gen: v7x
topology: tpu7x:2x2x1
jax: 0.10.0
libtpu: 0.0.40
codegen_flags: <defaults>
</compile_context>

<pallas_src>
import jax
import jax.numpy as jnp
from jax import lax
from jax.experimental import pallas as pl
from jax.experimental.pallas import tpu as pltpu


def _round_up(n, m):
    return ((n + m - 1) // m) * m


def _stack_fused_kernel(x_ref, w1_ref, b1_ref, w2t_ref, b2_ref, out_ref):
    # Hidden layer for the whole ensemble: [tile_n, MHp]
    h = jnp.dot(x_ref[...], w1_ref[...], preferred_element_type=jnp.float32)
    h = jnp.maximum(h + b1_ref[...], 0.0)
    # Second matmul contracted on the hidden dim of BOTH operands
    # (lhs [OUT, MHp], rhs [tile_n, MHp]) -> lane-dense transposed output
    # [OUT, tile_n] with no explicit transpose op.
    out_t = lax.dot_general(
        w2t_ref[...], h, (((1,), (1,)), ((), ())),
        preferred_element_type=jnp.float32)
    out_ref[...] = out_t + b2_ref[...]


def stack_forward(x, params, mode='sum', tile_n=4096):
    """Pallas equivalent of Stack.forward.

    x:      [N, D] float32 atom features (the 'batch').
    params: dict of stacked per-model weights:
            w1 [M, D, H], b1 [M, 1, H],
            w2e [M, H, 1], b2e [M, 1, 1],
            w2g [M, H, GO], b2g [M, 1, GO]
    Returns dict {'energy': [N, 1], 'energy_grad': [N, GO]}.
    """
    if mode not in ('sum', 'mean'):
        raise NotImplementedError(f'{mode} mode is not implemented for Stack')

    w1, b1 = params['w1'], params['b1']
    w2e, b2e = params['w2e'], params['b2e']
    w2g, b2g = params['w2g'], params['b2g']

    M, D, H = w1.shape
    EO = w2e.shape[-1]          # 1  (energy)
    GO = w2g.shape[-1]          # 3  (energy_grad)
    OUT = EO + GO
    N = x.shape[0]
    MH = M * H
    MHp = _round_up(MH, 128)    # fill full 128-lane vregs for h

    # --- wrapper-side weight fusion (exact for ReLU hidden layers) ---
    # Column order of W1_cat is (model outer, hidden inner); W2_cat rows match.
    w1_cat = jnp.transpose(w1, (1, 0, 2)).reshape(D, MH)               # [D, M*H]
    b1_cat = b1.reshape(1, MH)                                         # [1, M*H]
    w2_cat = jnp.concatenate([w2e, w2g], axis=-1).reshape(MH, OUT)     # [M*H, 1+GO]
    b2_cat = jnp.sum(jnp.concatenate([b2e, b2g], axis=-1), axis=0)     # [1, 1+GO]
    if mode == 'mean':
        inv = 1.0 / float(M)
        w2_cat = w2_cat * inv
        b2_cat = b2_cat * inv

    # Pad hidden dim to a multiple of 128 (zero cols/rows contribute exactly 0).
    if MHp != MH:
        w1_cat = jnp.pad(w1_cat, ((0, 0), (0, MHp - MH)))
        b1_cat = jnp.pad(b1_cat, ((0, 0), (0, MHp - MH)))
        w2_cat = jnp.pad(w2_cat, ((0, MHp - MH), (0, 0)))
    w2t_cat = w2_cat.T                          # [OUT, MHp] (for NT dot_general)
    b2_col = b2_cat.T                           # [OUT, 1]

    # --- row tiling: big tiles, multiple of 128 ---
    tile_n = max(128, (int(tile_n) // 128) * 128)
    n_up = _round_up(N, 128)
    if n_up <= tile_n:
        # Single block: tiny pad (<=127 rows) so the block exactly divides.
        tile_n = n_up
        if n_up != N:
            x = jnp.pad(x, ((0, n_up - N), (0, 0)))
        n_rows = n_up
    else:
        # Multi-block: no padding pass over x; final block is partial
        # (garbage tail rows are masked on write and sliced off below).
        n_rows = N
    grid = (pl.cdiv(n_rows, tile_n),)

    flops = 2 * N * D * MHp + 2 * N * MHp * OUT
    bytes_accessed = 4 * (N * D + D * MHp + MHp + MHp * OUT + OUT + OUT * N)

    out_t = pl.pallas_call(
        _stack_fused_kernel,
        out_shape=jax.ShapeDtypeStruct((OUT, n_rows), jnp.float32),
        grid_spec=pltpu.PrefetchScalarGridSpec(
            num_scalar_prefetch=0,
            grid=grid,
            in_specs=[
                pl.BlockSpec((tile_n, D), lambda i: (i, 0)),     # x row tile
                pl.BlockSpec((D, MHp), lambda i: (0, 0)),        # fused W1 (resident)
                pl.BlockSpec((1, MHp), lambda i: (0, 0)),        # fused b1
                pl.BlockSpec((OUT, MHp), lambda i: (0, 0)),      # fused W2ᵀ (both heads)
                pl.BlockSpec((OUT, 1), lambda i: (0, 0)),        # fused b2 (summed, col)
            ],
            out_specs=pl.BlockSpec((OUT, tile_n), lambda i: (0, i)),  # lane-dense
        ),
        compiler_params=pltpu.CompilerParams(
            dimension_semantics=("parallel",)),   # independent row tiles
        cost_estimate=pl.CostEstimate(
            flops=flops, transcendentals=0, bytes_accessed=bytes_accessed),
    )(x, w1_cat, b1_cat, w2t_cat, b2_col)

    return {'energy': out_t[:EO, :N].T, 'energy_grad': out_t[EO:, :N].T}


def _reference(x, params, mode):
    """Pure-JAX reference (mirrors the PyTorch Stack.forward loop)."""
    M = params['w1'].shape[0]
    out = None
    for m in range(M):
        h = jnp.maximum(x @ params['w1'][m] + params['b1'][m], 0.0)
        e = h @ params['w2e'][m] + params['b2e'][m]
        g = h @ params['w2g'][m] + params['b2g'][m]
        if out is None:
            out = {'energy': e, 'energy_grad': g}
        else:
            out = {'energy': out['energy'] + e,
                   'energy_grad': out['energy_grad'] + g}
    if mode == 'mean':
        out = {k: v / M for k, v in out.items()}
    return out


def _init_params(key, num_models, D, H, GO):
    ks = jax.random.split(key, 6)
    return {
        'w1':  jax.random.normal(ks[0], (num_models, D, H), jnp.float32) * 0.1,
        'b1':  jax.random.normal(ks[1], (num_models, 1, H), jnp.float32) * 0.1,
        'w2e': jax.random.normal(ks[2], (num_models, H, 1), jnp.float32) * 0.1,
        'b2e': jax.random.normal(ks[3], (num_models, 1, 1), jnp.float32) * 0.1,
        'w2g': jax.random.normal(ks[4], (num_models, H, GO), jnp.float32) * 0.1,
        'b2g': jax.random.normal(ks[5], (num_models, 1, GO), jnp.float32) * 0.1,
    }


if __name__ == "__main__":
    key = jax.random.PRNGKey(0)
    kx1, kx2, kx3, kp = jax.random.split(key, 4)

    D, H, GO = 16, 32, 3
    NUM_MODELS = 3
    params = _init_params(kp, NUM_MODELS, D, H, GO)

    # (x, tile_n) pairs exercising: single padded block (N=32 -> 128),
    # single padded block with ragged N (300 -> 384), and the unpadded
    # cdiv-grid path with a partial final block (600 rows at tile 256).
    test_cases = [
        (jax.random.normal(kx1, (32, D), jnp.float32), 4096),
        (jax.random.normal(kx2, (300, D), jnp.float32), 4096),
        (jax.random.normal(kx3, (600, D), jnp.float32), 256),
    ]

    for x, tn in test_cases:
        for mode in ('sum', 'mean'):
            out = stack_forward(x, params, mode=mode, tile_n=tn)
            jax.block_until_ready(out)
            ref = _reference(x, params, mode)
            for k in ('energy', 'energy_grad'):
                assert out[k].shape == ref[k].shape, \
                    f"shape mismatch for {k}: {out[k].shape} vs {ref[k].shape}"
                assert jnp.allclose(out[k], ref[k], atol=1e-5, rtol=1e-5), \
                    f"mismatch for key {k} in mode {mode} (N={x.shape[0]})"

    print("KERNEL_OK")
</pallas_src>

<mosaic_0001>
module attributes {stable_mosaic.version = 11 : i64} {
  func.func @_stack_fused_kernel(%arg0: i32, %arg1: memref<128x16xf32, #tpu.memory_space<vmem>>, %arg2: memref<16x128xf32, #tpu.memory_space<vmem>>, %arg3: memref<1x128xf32, #tpu.memory_space<vmem>>, %arg4: memref<4x128xf32, #tpu.memory_space<vmem>>, %arg5: memref<4x1xf32, #tpu.memory_space<vmem>>, %arg6: memref<4x128xf32, #tpu.memory_space<vmem>>) attributes {dimension_semantics = [#tpu.dimension_semantics<parallel>], iteration_bounds = array<i64: 1>, scalar_prefetch = 0 : i64, scratch_operands = 0 : i64, tpu.core_type = #tpu.core_type<tc>, window_params = [{transform_indices = @transform_0, window_bounds = array<i64: 128, 16>}, {pipeline_mode = #tpu.pipeline_mode<synchronous>, transform_indices = @transform_1, window_bounds = array<i64: 16, 128>}, {pipeline_mode = #tpu.pipeline_mode<synchronous>, transform_indices = @transform_2, window_bounds = array<i64: 1, 128>}, {pipeline_mode = #tpu.pipeline_mode<synchronous>, transform_indices = @transform_3, window_bounds = array<i64: 4, 128>}, {pipeline_mode = #tpu.pipeline_mode<synchronous>, transform_indices = @transform_4, window_bounds = array<i64: 4, 1>}, {transform_indices = @transform_5, window_bounds = array<i64: 4, 128>}]} {
    %c0 = arith.constant 0 : index
    %c0_0 = arith.constant 0 : index
    %0 = vector.load %arg1[%c0, %c0_0] : memref<128x16xf32, #tpu.memory_space<vmem>>, vector<128x16xf32>
    %c0_1 = arith.constant 0 : index
    %c0_2 = arith.constant 0 : index
    %1 = vector.load %arg2[%c0_1, %c0_2] : memref<16x128xf32, #tpu.memory_space<vmem>>, vector<16x128xf32>
    %cst = arith.constant dense<0.000000e+00> : vector<128x128xf32>
    %2 = tpu.matmul %0, %1, %cst {dimension_numbers = #tpu.dot_dimension_numbers<[1], [0], [0], [1], [0, 0, 1, 1], [], []>} : vector<128x16xf32>, vector<16x128xf32>, vector<128x128xf32> -> vector<128x128xf32>
    %c0_3 = arith.constant 0 : index
    %c0_4 = arith.constant 0 : index
    %3 = vector.load %arg3[%c0_3, %c0_4] : memref<1x128xf32, #tpu.memory_space<vmem>>, vector<1x128xf32>
    %4 = vector.broadcast %3 : vector<1x128xf32> to vector<128x128xf32>
    %5 = arith.addf %2, %4 : vector<128x128xf32>
    %cst_5 = arith.constant 0.000000e+00 : f32
    %6 = vector.broadcast %cst_5 : f32 to vector<128x128xf32>
    %7 = arith.maximumf %5, %6 : vector<128x128xf32>
    %c0_6 = arith.constant 0 : index
    %c0_7 = arith.constant 0 : index
    %8 = vector.load %arg4[%c0_6, %c0_7] : memref<4x128xf32, #tpu.memory_space<vmem>>, vector<4x128xf32>
    %cst_8 = arith.constant dense<0.000000e+00> : vector<4x128xf32>
    %9 = tpu.matmul %8, %7, %cst_8 {dimension_numbers = #tpu.dot_dimension_numbers<[1], [1], [0], [0], [0, 0, 1, 0], [], []>} : vector<4x128xf32>, vector<128x128xf32>, vector<4x128xf32> -> vector<4x128xf32>
    %c0_9 = arith.constant 0 : index
    %c0_10 = arith.constant 0 : index
    %10 = vector.load %arg5[%c0_9, %c0_10] : memref<4x1xf32, #tpu.memory_space<vmem>>, vector<4x1xf32>
    %11 = vector.broadcast %10 : vector<4x1xf32> to vector<4x128xf32>
    %12 = arith.addf %9, %11 : vector<4x128xf32>
    %c0_11 = arith.constant 0 : index
    %c0_12 = arith.constant 0 : index
    %13 = vector.load %arg6[%c0_11, %c0_12] : memref<4x128xf32, #tpu.memory_space<vmem>>, vector<4x128xf32>
    tpu.vector_store %arg6[%c0_11, %c0_12], %12 {strides = array<i32>} : memref<4x128xf32, #tpu.memory_space<vmem>>, vector<4x128xf32>,
    return
  }
  func.func @transform_0(%arg0: i32) -> (i32, i32) {
    %c0_i32 = arith.constant 0 : i32
    %c0_i32_0 = arith.constant 0 : i32
    return %arg0, %c0_i32 : i32, i32
  }
  func.func @transform_1(%arg0: i32) -> (i32, i32) {
    %c0_i32 = arith.constant 0 : i32
    %c0_i32_0 = arith.constant 0 : i32
    %c0_i32_1 = arith.constant 0 : i32
    return %c0_i32, %c0_i32_0 : i32, i32
  }
  func.func @transform_2(%arg0: i32) -> (i32, i32) {
    %c0_i32 = arith.constant 0 : i32
    %c0_i32_0 = arith.constant 0 : i32
    %c0_i32_1 = arith.constant 0 : i32
    return %c0_i32, %c0_i32_0 : i32, i32
  }
  func.func @transform_3(%arg0: i32) -> (i32, i32) {
    %c0_i32 = arith.constant 0 : i32
    %c0_i32_0 = arith.constant 0 : i32
    %c0_i32_1 = arith.constant 0 : i32
    return %c0_i32, %c0_i32_0 : i32, i32
  }
  func.func @transform_4(%arg0: i32) -> (i32, i32) {
    %c0_i32 = arith.constant 0 : i32
    %c0_i32_0 = arith.constant 0 : i32
    %c0_i32_1 = arith.constant 0 : i32
    return %c0_i32, %c0_i32_0 : i32, i32
  }
  func.func @transform_5(%arg0: i32) -> (i32, i32) {
    %c0_i32 = arith.constant 0 : i32
    %c0_i32_0 = arith.constant 0 : i32
    return %c0_i32, %arg0 : i32, i32
  }
}

</mosaic_0001>

<bundles_post_ra>
// kernel: tpu_custom_call.1
= control target key start
LH: loop header
LB: loop body
LE: loop exit
PB: predicated region body
PF: predicated region fallthrough
CT: control target
= control target key end

     0   :  { %vm46_vm0 = vcmask 130048   ;;  %s655_s0 = inlined_call_operand.vmem [shape: f32[128,16], index: 0, kind: input, shape index: {}]   ;;  %s656_s1 = inlined_call_operand.vmem [shape: f32[16,128], index: 1, kind: input, shape index: {}]   ;;  %s657_s2 = inlined_call_operand.vmem [shape: f32[1,128], index: 2, kind: input, shape index: {}]   ;;  %s658_s3 = inlined_call_operand.vmem [shape: f32[4,128], index: 3, kind: input, shape index: {}]   ;;  %s659_s4 = inlined_call_operand.vmem [shape: f32[4,1], index: 4, kind: input, shape index: {}]   ;;  %s660_s5 = inlined_call_operand.hbm [shape: f32[4,128], index: 5, kind: output, shape index: {}]  }
   0x1   :  { %v37_v0 = vld [vmem:[%s656_s1] sm:$0xff]  ;;  %v38_v1 = vld [vmem:[%s656_s1 + $0x8] sm:$0xff]  ;;  %v23_v5 = vld [vmem:[%s655_s0 + $0x10] sm:$0xff] }
   0x2   :  { %v21_v2 = vld [vmem:[%s655_s0] sm:$0xff]  ;;  %v463_v3 = vpack.c.bf16 %v38_v1, %v37_v0  ;;  %v22_v4 = vld [vmem:[%s655_s0 + $0x8] sm:$0xff] }
   0x3   :  { %404 = vmatprep.mubr.msk.f32.mxu0 %vm46_vm0, %v21_v2 }
   0x4   :  { %464 = vmatprep.subr.bf16.mxu0 %v463_v3 }
   0x5   :  { %466 = vmatpush3.bf16.msra.mxu0 %v463_v3 }
   0x6   :  { %10 = vsyncpa [#allocation3], 0  ;;  %v24_v6 = vld [vmem:[%s655_s0 + $0x18] sm:$0xff]  ;;  %v25_v7 = vld [vmem:[%s655_s0 + $0x20] sm:$0xff]  ;;  %v521_v19 = vmov 0.0|0.0   ;;  %vm522_vm1 = vmmov 0  }
   0x7   :  { %v26_v8 = vld [vmem:[%s655_s0 + $0x28] sm:$0xff]  ;;  %v27_v9 = vld [vmem:[%s655_s0 + $0x30] sm:$0xff]  ;;  %v28_v10 = vld [vmem:[%s655_s0 + $0x38] sm:$0xff]  ;;  %467 = vmatprep.subr.bf16.mxu1 %v521_v19  ;;  %v523_v20 = vmov 0.0   ;;  %v524_v22 = vmov 0  }
   0x8   :  { %405 = vmatmul.mubr.msk.f32.vlgmr.msra.gmra.mrb[0].mxu0 %vm46_vm0, %v22_v4  ;;  %v29_v11 = vld [vmem:[%s655_s0 + $0x40] sm:$0xff]  ;;  %v30_v12 = vld [vmem:[%s655_s0 + $0x48] sm:$0xff]  ;;  %v31_v13 = vld [vmem:[%s655_s0 + $0x50] sm:$0xff]  ;;  %460 = vmatprep.mubr.msk.f32.mxu1 %vm522_vm1, %v523_v20 }
   0x9   :  { %407 = vmatprep.mubr.msk.f32.mxu0 %vm46_vm0, %v23_v5  ;;  %v32_v14 = vld [vmem:[%s655_s0 + $0x58] sm:$0xff]  ;;  %v33_v15 = vld [vmem:[%s655_s0 + $0x60] sm:$0xff]  ;;  %v34_v16 = vld [vmem:[%s655_s0 + $0x68] sm:$0xff]  ;;  %496 = vset.pattern.permute.xlu0 %v524_v22 }
   0xa   :  { %v35_v17 = vld [vmem:[%s655_s0 + $0x70] sm:$0xff]  ;;  %v36_v18 = vld [vmem:[%s655_s0 + $0x78] sm:$0xff]  ;;  %v257_v21 = vld [vmem:[%s659_s4] sm:$0xf]  ;;  %s525_s4 = smov [#allocation2]  }
   0xb   :  { %260 = vperm.xlu0 %496, %v257_v21   ;;  %v348_v23 = vld [vmem:[%s657_s2] ss:$0 sm:$0xff]  ;;  %s340_s6 = sshll.u32 %s525_s4, 4  ;;  %s341_s6 = int_to_ptr.vmem [resolvable:$true] %s340_s6 }
   0xc   :  { %408 = vmatmul.mubr.msk.f32.gmra.mrb[2].mxu0 %vm46_vm0, %v24_v6  ;;  %s497_s7 = scalar_lea.vmem %s341_s6, 64  ;;  %p502_p1 = scmp.lt.s32.totalorder %s341_s6, %s341_s6 }
   0xd   :  { %410 = vmatprep.mubr.msk.f32.mxu0 %vm46_vm0, %v25_v7  ;;  %p498_p0 = scmp.ne.s32.totalorder %s341_s6, %s497_s7  ;;  %p503_p2 = scmp.lt.s32.totalorder %s497_s7, %s497_s7 }
   0xf   :  { %p504_p3 = por %p503_p2, %p502_p1 }
  0x10   :  { %411 = vmatmul.mubr.msk.f32.gmra.mrb[4].mxu0 %vm46_vm0, %v26_v8 }
  0x11   :  { %413 = vmatprep.mubr.msk.f32.mxu0 %vm46_vm0, %v27_v9  ;;  %p505_p4 = pnand %p504_p3, %p498_p0 }
  0x14   :  { %414 = vmatmul.mubr.msk.f32.gmra.mrb[6].mxu0 %vm46_vm0, %v28_v10 }
  0x15   :  { %416 = vmatprep.mubr.msk.f32.mxu0 %vm46_vm0, %v29_v11 }
  0x18   :  { %417 = vmatmul.mubr.msk.f32.gmra.mrb[8].mxu0 %vm46_vm0, %v30_v12 }
  0x19   :  { %419 = vmatprep.mubr.msk.f32.mxu0 %vm46_vm0, %v31_v13 }
  0x1c   :  { %420 = vmatmul.mubr.msk.f32.gmra.mrb[10].mxu0 %vm46_vm0, %v32_v14 }
  0x1d   :  { %422 = vmatprep.mubr.msk.f32.mxu0 %vm46_vm0, %v33_v15 }
  0x20   :  { %423 = vmatmul.mubr.msk.f32.gmra.mrb[12].mxu0 %vm46_vm0, %v34_v16  ;;  %v256_v16 = vld [vmem:[%s658_s3] sm:$0xf] }
  0x21   :  { %425 = vmatprep.mubr.msk.f32.mxu0 %vm46_vm0, %v35_v17 }
  0x24   :  { %426 = vmatmul.mubr.msk.f32.gmra.mrb[14].mxu0 %vm46_vm0, %v36_v18 }
  0x8a   :  { %v261_v17 = vpop.permute.xlu0 %260 }
  0xdb   :  { %v406_v24 = vpop.f32.mrb[0].mxu0 }
  0xdc   :  { %v167_v25 = vadd.f32 %v406_v24, %v348_v23  ;;  %v161_v26 = vpop.f32.mrb[1].mxu0 }
  0xdd   :  { %v162_v27 = vadd.f32 %v348_v23, %v161_v26 }
  0xde   :  { %v241_v28 = vmax.f32 %v167_v25, 0.0 }
  0xdf   :  { %v240_v29 = vmax.f32 %v162_v27, 0.0  ;;  %v409_v30 = vpop.f32.mrb[2].mxu0 }
  0xe0   :  { %v177_v31 = vadd.f32 %v409_v30, %v348_v23  ;;  %v171_v32 = vpop.f32.mrb[3].mxu0 }
  0xe1   :  { %v172_v33 = vadd.f32 %v348_v23, %v171_v32  ;;  %v468_v34 = vpack.c.bf16 %v241_v28, %v240_v29 }
  0xe2   :  { %v243_v35 = vmax.f32 %v177_v31, 0.0 }
  0xe3   :  { %v242_v36 = vmax.f32 %v172_v33, 0.0  ;;  %469 = vmatpush3.bf16.xpose.msra.mxu1 %v468_v34  ;;  %v412_v37 = vpop.f32.mrb[4].mxu0 }
  0xe4   :  { %v187_v38 = vadd.f32 %v412_v37, %v348_v23  ;;  %470 = vmatprep.subr.bf16.mxu1 %v521_v19  ;;  %v181_v39 = vpop.f32.mrb[5].mxu0 }
  0xe5   :  { %v471_v40 = vpack.c.bf16 %v243_v35, %v242_v36  ;;  %v182_v41 = vadd.f32 %v348_v23, %v181_v39 }
  0xe6   :  { %v245_v42 = vmax.f32 %v187_v38, 0.0 }
  0xe7   :  { %v244_v43 = vmax.f32 %v182_v41, 0.0  ;;  %v415_v44 = vpop.f32.mrb[6].mxu0 }
  0xe8   :  { %v197_v45 = vadd.f32 %v415_v44, %v348_v23  ;;  %v191_v46 = vpop.f32.mrb[7].mxu0 }
  0xe9   :  { %v474_v47 = vpack.c.bf16 %v245_v42, %v244_v43  ;;  %v192_v48 = vadd.f32 %v348_v23, %v191_v46 }
  0xea   :  { %v247_v49 = vmax.f32 %v197_v45, 0.0 }
  0xeb   :  { %472 = vmatpush3.bf16.xpose.msra.mxu1 %v471_v40  ;;  %v246_v50 = vmax.f32 %v192_v48, 0.0  ;;  %v418_v51 = vpop.f32.mrb[8].mxu0 }
  0xec   :  { %473 = vmatprep.subr.bf16.mxu1 %v521_v19  ;;  %v207_v52 = vadd.f32 %v418_v51, %v348_v23  ;;  %v201_v53 = vpop.f32.mrb[9].mxu0 }
  0xed   :  { %v477_v54 = vpack.c.bf16 %v247_v49, %v246_v50  ;;  %v202_v55 = vadd.f32 %v348_v23, %v201_v53 }
  0xee   :  { %v249_v56 = vmax.f32 %v207_v52, 0.0 }
  0xef   :  { %v248_v57 = vmax.f32 %v202_v55, 0.0  ;;  %v421_v58 = vpop.f32.mrb[10].mxu0 }
  0xf0   :  { %v217_v59 = vadd.f32 %v421_v58, %v348_v23  ;;  %v211_v60 = vpop.f32.mrb[11].mxu0 }
  0xf1   :  { %v480_v61 = vpack.c.bf16 %v249_v56, %v248_v57  ;;  %v212_v62 = vadd.f32 %v348_v23, %v211_v60 }
  0xf2   :  { %v251_v63 = vmax.f32 %v217_v59, 0.0 }
  0xf3   :  { %475 = vmatpush3.bf16.xpose.msra.mxu1 %v474_v47  ;;  %v250_v0 = vmax.f32 %v212_v62, 0.0  ;;  %v424_v1 = vpop.f32.mrb[12].mxu0 }
  0xf4   :  { %476 = vmatprep.subr.bf16.mxu1 %v521_v19  ;;  %v227_v2 = vadd.f32 %v424_v1, %v348_v23  ;;  %v221_v3 = vpop.f32.mrb[13].mxu0 }
  0xf5   :  { %v483_v4 = vpack.c.bf16 %v251_v63, %v250_v0  ;;  %v222_v5 = vadd.f32 %v348_v23, %v221_v3 }
  0xf6   :  { %v253_v6 = vmax.f32 %v227_v2, 0.0 }
  0xf7   :  { %v252_v7 = vmax.f32 %v222_v5, 0.0  ;;  %v427_v8 = vpop.f32.mrb[14].mxu0 }
  0xf8   :  { %v237_v9 = vadd.f32 %v427_v8, %v348_v23  ;;  %v231_v10 = vpop.f32.mrb[15].mxu0 }
  0xf9   :  { %v486_v11 = vpack.c.bf16 %v253_v6, %v252_v7  ;;  %v232_v12 = vadd.f32 %v348_v23, %v231_v10 }
  0xfa   :  { %v255_v13 = vmax.f32 %v237_v9, 0.0 }
  0xfb   :  { %478 = vmatpush3.bf16.xpose.msra.mxu1 %v477_v54  ;;  %v254_v14 = vmax.f32 %v232_v12, 0.0 }
  0xfc   :  { %479 = vmatprep.subr.bf16.mxu1 %v521_v19 }
  0xfd   :  { %v489_v15 = vpack.c.bf16 %v255_v13, %v254_v14 }
 0x103   :  { %481 = vmatpush3.bf16.xpose.msra.mxu1 %v480_v61 }
 0x104   :  { %482 = vmatprep.subr.bf16.mxu1 %v521_v19 }
 0x10b   :  { %484 = vmatpush3.bf16.xpose.msra.mxu1 %v483_v4 }
 0x10c   :  { %485 = vmatprep.subr.bf16.mxu1 %v521_v19 }
 0x113   :  { %487 = vmatpush3.bf16.xpose.msra.mxu1 %v486_v11 }
 0x114   :  { %488 = vmatprep.subr.bf16.mxu1 %v521_v19 }
 0x11b   :  { %490 = vmatpush3.bf16.xpose.msra.mxu1 %v489_v15 }
 0x122   :  { %461 = vmatmul.mubr.f32.vlgmr.msra.gmra.mrb[0].mxu1 %v256_v16 }
 0x1f5   :  { %v329_v18 = vpop.f32.mrb[0].mxu1 }
 0x1f6   :  { %v330_v20 = vadd.f32 %v329_v18, %v261_v17  ;;  %v462_v21 = vpop.f32.mrb[1].mxu1 }
 0x1f8   :  { %333 = vst [vmem:[#allocation2] sm:$0xf] %v330_v20 }
 0x1f9   :  { %508 = shalt.err (!%p505_p4)
}
 0x1fa   :  { %s509_s3 = scalar_lea.hbm %s660_s5, 64 }
 0x1fb   :  { %p510_p5 = scmp.ne.s32.totalorder %s660_s5, %s509_s3  ;;  %p513_p6 = scmp.lt.u32.totalorder %s509_s3, %s660_s5 }
 0x1fd   :  { %p515_p7 = pnand %p513_p6, %p510_p5 }
 0x1ff   :  { %518 = shalt.err (!%p515_p7)
}
 0x200   :  { %343 = dma.vmem_to_hbm [thread:$0]  %s341_s6, 64, %s660_s5, [#allocation3]  }
 0x201   :  { %519 = dma.done.wait [#allocation3], 64  }
 0x202   :  { %520 = vsyncadd [#allocation3], 4294967232 }
 0x203   :  { %347 = vsyncpa [#allocation3], 1 }

</bundles_post_ra>
